<compile_context>
chip_gen: v7x
topology: tpu7x:2x2x1
jax: 0.10.0
libtpu: 0.0.40
codegen_flags: <defaults>
</compile_context>

<pallas_src>
import functools

import jax
import jax.numpy as jnp
from jax.experimental import pallas as pl
from jax.experimental.pallas import tpu as pltpu

_LANE = 128


def _round_up(x, m):
    return (x + m - 1) // m * m


def _decoder_kernel(n_hidden, z_ref, lab_ref, wz_ref, wc_ref, b0_ref, *refs):
    """One batch tile of the decoder MLP.

    refs layout after the named args:
      (w_i, b_i) for the remaining n_hidden layers (hidden[1:] + mean layer
      when n_hidden >= 1, or nothing when n_hidden == 0), then loc_ref.
    The first linear layer (hidden[0] if present, else the mean layer) is
    split into wz (acting on z) and wc (acting on the one-hot labels).
    """
    rest = refs[: 2 * n_hidden]
    loc_ref = refs[2 * n_hidden]

    tile_n = z_ref.shape[0]
    cp = wc_ref.shape[0]  # padded num_cat (multiple of 128)

    z = z_ref[...].astype(jnp.float32)                       # (tile_n, ZP)
    lab = lab_ref[...]                                        # (tile_n, 1) int32

    # In-kernel one-hot: columns >= num_cat never match (labels < num_cat),
    # and padded rows of wc are zero, so the padding is inert.
    col = jax.lax.broadcasted_iota(jnp.int32, (tile_n, cp), 1)
    c = (col == lab).astype(jnp.float32)                      # (tile_n, CP)

    # First (split) layer: z @ Wz + c @ Wc + b0; both matmuls are lane-dense MXU.
    h = (jnp.dot(z, wz_ref[...], preferred_element_type=jnp.float32)
         + jnp.dot(c, wc_ref[...], preferred_element_type=jnp.float32)
         + b0_ref[...])
    if n_hidden >= 1:                       # first split layer is a hidden layer
        h = jnp.maximum(h, 0.0)             # non_linear=True -> ReLU

    for i in range(n_hidden):
        w = rest[2 * i][...]
        b = rest[2 * i + 1][...]
        h = jnp.dot(h, w, preferred_element_type=jnp.float32) + b
        if i < n_hidden - 1:                # last layer is dec_mean -> no ReLU
            h = jnp.maximum(h, 0.0)

    loc_ref[...] = h.astype(loc_ref.dtype)


def _forward_flat(z, labels, params, num_cat, tile_n):
    """2-D (N, z_dim) forward. Returns loc (N, input_dim), scale (1, input_dim)."""
    hidden = params["hidden"]
    w_mean, b_mean = params["mean"]
    logvar = params["logvar"]

    n, z_dim = z.shape
    input_dim = w_mean.shape[1]
    n_hidden = len(hidden)

    # All linear layers in order: hidden layers then the mean layer.
    layers = list(hidden) + [(w_mean, b_mean)]
    out_dims = [w.shape[1] for w, _ in layers]
    out_dims_p = [_round_up(d, _LANE) for d in out_dims]

    zp = _round_up(z_dim, _LANE)
    cp = _round_up(num_cat, _LANE)
    idp = out_dims_p[-1]

    # Batch tile: multiple of 8 sublanes, capped by tile_n.
    tile = min(max(8, tile_n), _round_up(n, 8))
    tile = _round_up(tile, 8)
    n_pad = _round_up(n, tile)

    f32 = jnp.float32
    # Padded activations (zero-padded rows/lanes; padded rows are sliced off).
    zpad = jnp.zeros((n_pad, zp), f32).at[:n, :z_dim].set(z.astype(f32))
    labpad = jnp.zeros((n_pad, 1), jnp.int32).at[:n, 0].set(
        labels.astype(jnp.int32))

    # First layer split into W_z / W_c (rows 0:z_dim act on z, rest on one-hot).
    w0, b0 = layers[0]
    d0 = out_dims[0]
    d0p = out_dims_p[0]
    wz = jnp.zeros((zp, d0p), f32).at[:z_dim, :d0].set(w0[:z_dim])
    wc = jnp.zeros((cp, d0p), f32).at[:num_cat, :d0].set(w0[z_dim:])
    b0p = jnp.zeros((1, d0p), f32).at[:, :d0].set(b0)

    # Remaining layers, zero-padded to lane multiples.
    rest_flat = []
    for li in range(1, len(layers)):
        w, b = layers[li]
        din, dout = w.shape
        dinp, doutp = out_dims_p[li - 1], out_dims_p[li]
        wp = jnp.zeros((dinp, doutp), f32).at[:din, :dout].set(w)
        bp = jnp.zeros((1, doutp), f32).at[:, :dout].set(b)
        rest_flat += [wp, bp]

    kernel = functools.partial(_decoder_kernel, n_hidden)

    tile_map = lambda i: (i, 0)    # batch-tiled activations / output
    const_map = lambda i: (0, 0)   # weights/biases: VMEM-resident, same block

    in_specs = [
        pl.BlockSpec((tile, zp), tile_map),
        pl.BlockSpec((tile, 1), tile_map),
        pl.BlockSpec(wz.shape, const_map),
        pl.BlockSpec(wc.shape, const_map),
        pl.BlockSpec(b0p.shape, const_map),
    ] + [pl.BlockSpec(a.shape, const_map) for a in rest_flat]

    out_spec = pl.BlockSpec((tile, idp), tile_map)

    loc_pad = pl.pallas_call(
        kernel,
        out_shape=jax.ShapeDtypeStruct((n_pad, idp), f32),
        grid=(n_pad // tile,),
        in_specs=in_specs,
        out_specs=out_spec,
        compiler_params=pltpu.CompilerParams(
            dimension_semantics=("parallel",),
            vmem_limit_bytes=64 * 1024 * 1024,
        ),
    )(zpad, labpad, wz, wc, b0p, *rest_flat)

    loc = loc_pad[:n, :input_dim]
    # Batch-independent scale stays in the wrapper (one EUP op, no per-tile DMA).
    scale = jnp.exp(0.5 * logvar)
    return loc, scale


def conditional_variational_decoder_forward(z, labels, params, num_cat,
                                             *, tile_n=256):
    """Forward pass of ConditionalVariationalDecoder.

    Args:
      z:      (N, z_dim) or (K, N, z_dim) float32 latents.
      labels: (N,) integer class labels in [0, num_cat).
      params: dict with
              'hidden': list of (W (in,out), b (1,out)) for hidden layers
                        (first W has in = z_dim + num_cat),
              'mean':   (W (in,out), b (1,out)) for dec_mean_layer,
              'logvar': (1, input_dim) logvar_out parameter.
      num_cat: number of label categories.
      tile_n:  batch tile size (rounded/clamped internally).

    Returns:
      loc with z's leading shape + (input_dim,), scale (1, input_dim).
    """
    labels = labels.astype(jnp.int32)
    if z.ndim == 3:
        # 3-D branch of the module: c.repeat(z.shape[0], 1, 1) -> flatten the
        # leading axes, tile the labels, then restore the leading shape.
        k_lead, n0, z_dim = z.shape
        loc, scale = _forward_flat(z.reshape(k_lead * n0, z_dim),
                                   jnp.tile(labels, k_lead),
                                   params, num_cat, tile_n)
        return loc.reshape(k_lead, n0, -1), scale
    return _forward_flat(z, labels, params, num_cat, tile_n)


def init_params(key, z_dim, num_cat, hidden_layer_dim, input_dim, init_logvar):
    """Deterministic parameter init mirroring the module's layer shapes."""
    layer_sizes = [z_dim + num_cat] + list(hidden_layer_dim) + [input_dim]
    keys = jax.random.split(key, 2 * len(layer_sizes))

    def lin(kw, kb, d_in, d_out):
        bound = 1.0 / jnp.sqrt(d_in)
        w = jax.random.uniform(kw, (d_in, d_out), jnp.float32, -bound, bound)
        b = jax.random.uniform(kb, (1, d_out), jnp.float32, -bound, bound)
        return w, b

    hidden = []
    k = 0
    # decoder_layers = all but the last linear (that one becomes dec_mean_layer)
    for d_in, d_out in zip(layer_sizes[:-2], layer_sizes[1:-1]):
        hidden.append(lin(keys[k], keys[k + 1], d_in, d_out))
        k += 2
    mean = lin(keys[k], keys[k + 1], layer_sizes[-2], layer_sizes[-1])

    logvar = jnp.full((1, input_dim), float(init_logvar), dtype=jnp.float32)
    return {"hidden": hidden, "mean": mean, "logvar": logvar}


def _reference(z, labels, params, num_cat):
    """Pure-JAX reference (mirrors the PyTorch forward, 2-D path)."""
    c = jax.nn.one_hot(labels, num_cat, dtype=z.dtype)
    h = jnp.concatenate([z, c], axis=-1)
    for w, b in params["hidden"]:
        h = jnp.maximum(h @ w + b, 0.0)
    loc = h @ params["mean"][0] + params["mean"][1]
    scale = jnp.exp(0.5 * params["logvar"])
    return loc, scale


if __name__ == "__main__":
    key = jax.random.PRNGKey(0)
    k_param, k_z, k_lab, k_z3 = jax.random.split(key, 4)

    # Small, module-consistent shapes. tile_n=8 so the (padded) batch of 20
    # exercises a multi-step grid (grid=(3,)) even at toy sizes.
    batch = 20
    z_dim = 8
    num_cat = 4
    hidden_layer_dim = [32, 16]   # layer_sizes = [12, 32, 16, 20]
    input_dim = 20
    init_logvar = -3.0

    params = init_params(k_param, z_dim, num_cat, hidden_layer_dim, input_dim,
                         init_logvar)

    z = jax.random.normal(k_z, (batch, z_dim), dtype=jnp.float32)
    labels = jax.random.randint(k_lab, (batch,), 0, num_cat, dtype=jnp.int32)

    # --- 2-D path ---
    loc, scale = conditional_variational_decoder_forward(z, labels, params,
                                                         num_cat, tile_n=8)
    jax.block_until_ready((loc, scale))

    loc_ref, scale_ref = _reference(z, labels, params, num_cat)
    assert loc.shape == (batch, input_dim) and scale.shape == (1, input_dim)
    assert jnp.allclose(loc, loc_ref, atol=1e-5), float(
        jnp.max(jnp.abs(loc - loc_ref)))
    assert jnp.allclose(scale, scale_ref, atol=1e-6)

    # --- 3-D path (c.repeat over the leading axis) ---
    k_lead = 3
    z3 = jax.random.normal(k_z3, (k_lead, batch, z_dim), dtype=jnp.float32)
    loc3, scale3 = conditional_variational_decoder_forward(z3, labels, params,
                                                           num_cat, tile_n=8)
    jax.block_until_ready((loc3, scale3))
    loc3_ref = jnp.stack(
        [_reference(z3[i], labels, params, num_cat)[0] for i in range(k_lead)])
    assert loc3.shape == (k_lead, batch, input_dim)
    assert jnp.allclose(loc3, loc3_ref, atol=1e-5), float(
        jnp.max(jnp.abs(loc3 - loc3_ref)))
    assert jnp.allclose(scale3, scale_ref, atol=1e-6)

    print("KERNEL_OK")
</pallas_src>

<mosaic_0001>
module attributes {stable_mosaic.version = 11 : i64} {
  func.func @_decoder_kernel(%arg0: i32, %arg1: memref<8x128xf32, #tpu.memory_space<vmem>>, %arg2: memref<8x1xi32, #tpu.memory_space<vmem>>, %arg3: memref<128x128xf32, #tpu.memory_space<vmem>>, %arg4: memref<128x128xf32, #tpu.memory_space<vmem>>, %arg5: memref<1x128xf32, #tpu.memory_space<vmem>>, %arg6: memref<128x128xf32, #tpu.memory_space<vmem>>, %arg7: memref<1x128xf32, #tpu.memory_space<vmem>>, %arg8: memref<128x128xf32, #tpu.memory_space<vmem>>, %arg9: memref<1x128xf32, #tpu.memory_space<vmem>>, %arg10: memref<8x128xf32, #tpu.memory_space<vmem>>) attributes {dimension_semantics = [#tpu.dimension_semantics<parallel>], iteration_bounds = array<i64: 3>, scalar_prefetch = 0 : i64, scratch_operands = 0 : i64, tpu.core_type = #tpu.core_type<tc>, window_params = [{transform_indices = @transform_0, window_bounds = array<i64: 8, 128>}, {transform_indices = @transform_1, window_bounds = array<i64: 8, 1>}, {pipeline_mode = #tpu.pipeline_mode<synchronous>, transform_indices = @transform_2, window_bounds = array<i64: 128, 128>}, {pipeline_mode = #tpu.pipeline_mode<synchronous>, transform_indices = @transform_3, window_bounds = array<i64: 128, 128>}, {pipeline_mode = #tpu.pipeline_mode<synchronous>, transform_indices = @transform_4, window_bounds = array<i64: 1, 128>}, {pipeline_mode = #tpu.pipeline_mode<synchronous>, transform_indices = @transform_5, window_bounds = array<i64: 128, 128>}, {pipeline_mode = #tpu.pipeline_mode<synchronous>, transform_indices = @transform_6, window_bounds = array<i64: 1, 128>}, {pipeline_mode = #tpu.pipeline_mode<synchronous>, transform_indices = @transform_7, window_bounds = array<i64: 128, 128>}, {pipeline_mode = #tpu.pipeline_mode<synchronous>, transform_indices = @transform_8, window_bounds = array<i64: 1, 128>}, {transform_indices = @transform_9, window_bounds = array<i64: 8, 128>}]} {
    %c0 = arith.constant 0 : index
    %c0_0 = arith.constant 0 : index
    %0 = vector.load %arg1[%c0, %c0_0] : memref<8x128xf32, #tpu.memory_space<vmem>>, vector<8x128xf32>
    %c0_1 = arith.constant 0 : index
    %c0_2 = arith.constant 0 : index
    %1 = vector.load %arg2[%c0_1, %c0_2] : memref<8x1xi32, #tpu.memory_space<vmem>>, vector<8x1xi32>
    %2 = tpu.iota {dimensions = array<i32: 1>} : vector<8x128xi32>
    %3 = vector.broadcast %1 : vector<8x1xi32> to vector<8x128xi32>
    %4 = arith.cmpi eq, %2, %3 : vector<8x128xi32>
    %5 = arith.extui %4 : vector<8x128xi1> to vector<8x128xi32>
    %6 = arith.sitofp %5 : vector<8x128xi32> to vector<8x128xf32>
    %c0_3 = arith.constant 0 : index
    %c0_4 = arith.constant 0 : index
    %7 = vector.load %arg3[%c0_3, %c0_4] : memref<128x128xf32, #tpu.memory_space<vmem>>, vector<128x128xf32>
    %cst = arith.constant dense<0.000000e+00> : vector<8x128xf32>
    %8 = tpu.matmul %0, %7, %cst {dimension_numbers = #tpu.dot_dimension_numbers<[1], [0], [0], [1], [0, 0, 1, 1], [], []>} : vector<8x128xf32>, vector<128x128xf32>, vector<8x128xf32> -> vector<8x128xf32>
    %c0_5 = arith.constant 0 : index
    %c0_6 = arith.constant 0 : index
    %9 = vector.load %arg4[%c0_5, %c0_6] : memref<128x128xf32, #tpu.memory_space<vmem>>, vector<128x128xf32>
    %cst_7 = arith.constant dense<0.000000e+00> : vector<8x128xf32>
    %10 = tpu.matmul %6, %9, %cst_7 {dimension_numbers = #tpu.dot_dimension_numbers<[1], [0], [0], [1], [0, 0, 1, 1], [], []>} : vector<8x128xf32>, vector<128x128xf32>, vector<8x128xf32> -> vector<8x128xf32>
    %11 = arith.addf %8, %10 : vector<8x128xf32>
    %c0_8 = arith.constant 0 : index
    %c0_9 = arith.constant 0 : index
    %12 = vector.load %arg5[%c0_8, %c0_9] : memref<1x128xf32, #tpu.memory_space<vmem>>, vector<1x128xf32>
    %13 = vector.broadcast %12 : vector<1x128xf32> to vector<8x128xf32>
    %14 = arith.addf %11, %13 : vector<8x128xf32>
    %cst_10 = arith.constant 0.000000e+00 : f32
    %15 = vector.broadcast %cst_10 : f32 to vector<8x128xf32>
    %16 = arith.maximumf %14, %15 : vector<8x128xf32>
    %c0_11 = arith.constant 0 : index
    %c0_12 = arith.constant 0 : index
    %17 = vector.load %arg6[%c0_11, %c0_12] : memref<128x128xf32, #tpu.memory_space<vmem>>, vector<128x128xf32>
    %c0_13 = arith.constant 0 : index
    %c0_14 = arith.constant 0 : index
    %18 = vector.load %arg7[%c0_13, %c0_14] : memref<1x128xf32, #tpu.memory_space<vmem>>, vector<1x128xf32>
    %cst_15 = arith.constant dense<0.000000e+00> : vector<8x128xf32>
    %19 = tpu.matmul %16, %17, %cst_15 {dimension_numbers = #tpu.dot_dimension_numbers<[1], [0], [0], [1], [0, 0, 1, 1], [], []>} : vector<8x128xf32>, vector<128x128xf32>, vector<8x128xf32> -> vector<8x128xf32>
    %20 = vector.broadcast %18 : vector<1x128xf32> to vector<8x128xf32>
    %21 = arith.addf %19, %20 : vector<8x128xf32>
    %cst_16 = arith.constant 0.000000e+00 : f32
    %22 = vector.broadcast %cst_16 : f32 to vector<8x128xf32>
    %23 = arith.maximumf %21, %22 : vector<8x128xf32>
    %c0_17 = arith.constant 0 : index
    %c0_18 = arith.constant 0 : index
    %24 = vector.load %arg8[%c0_17, %c0_18] : memref<128x128xf32, #tpu.memory_space<vmem>>, vector<128x128xf32>
    %c0_19 = arith.constant 0 : index
    %c0_20 = arith.constant 0 : index
    %25 = vector.load %arg9[%c0_19, %c0_20] : memref<1x128xf32, #tpu.memory_space<vmem>>, vector<1x128xf32>
    %cst_21 = arith.constant dense<0.000000e+00> : vector<8x128xf32>
    %26 = tpu.matmul %23, %24, %cst_21 {dimension_numbers = #tpu.dot_dimension_numbers<[1], [0], [0], [1], [0, 0, 1, 1], [], []>} : vector<8x128xf32>, vector<128x128xf32>, vector<8x128xf32> -> vector<8x128xf32>
    %27 = vector.broadcast %25 : vector<1x128xf32> to vector<8x128xf32>
    %28 = arith.addf %26, %27 : vector<8x128xf32>
    %c0_22 = arith.constant 0 : index
    %c0_23 = arith.constant 0 : index
    %29 = vector.load %arg10[%c0_22, %c0_23] : memref<8x128xf32, #tpu.memory_space<vmem>>, vector<8x128xf32>
    tpu.vector_store %arg10[%c0_22, %c0_23], %28 {strides = array<i32>} : memref<8x128xf32, #tpu.memory_space<vmem>>, vector<8x128xf32>,
    return
  }
  func.func @transform_0(%arg0: i32) -> (i32, i32) {
    %c0_i32 = arith.constant 0 : i32
    %c0_i32_0 = arith.constant 0 : i32
    return %arg0, %c0_i32 : i32, i32
  }
  func.func @transform_1(%arg0: i32) -> (i32, i32) {
    %c0_i32 = arith.constant 0 : i32
    %c0_i32_0 = arith.constant 0 : i32
    return %arg0, %c0_i32 : i32, i32
  }
  func.func @transform_2(%arg0: i32) -> (i32, i32) {
    %c0_i32 = arith.constant 0 : i32
    %c0_i32_0 = arith.constant 0 : i32
    %c0_i32_1 = arith.constant 0 : i32
    return %c0_i32, %c0_i32_0 : i32, i32
  }
  func.func @transform_3(%arg0: i32) -> (i32, i32) {
    %c0_i32 = arith.constant 0 : i32
    %c0_i32_0 = arith.constant 0 : i32
    %c0_i32_1 = arith.constant 0 : i32
    return %c0_i32, %c0_i32_0 : i32, i32
  }
  func.func @transform_4(%arg0: i32) -> (i32, i32) {
    %c0_i32 = arith.constant 0 : i32
    %c0_i32_0 = arith.constant 0 : i32
    %c0_i32_1 = arith.constant 0 : i32
    return %c0_i32, %c0_i32_0 : i32, i32
  }
  func.func @transform_5(%arg0: i32) -> (i32, i32) {
    %c0_i32 = arith.constant 0 : i32
    %c0_i32_0 = arith.constant 0 : i32
    %c0_i32_1 = arith.constant 0 : i32
    return %c0_i32, %c0_i32_0 : i32, i32
  }
  func.func @transform_6(%arg0: i32) -> (i32, i32) {
    %c0_i32 = arith.constant 0 : i32
    %c0_i32_0 = arith.constant 0 : i32
    %c0_i32_1 = arith.constant 0 : i32
    return %c0_i32, %c0_i32_0 : i32, i32
  }
  func.func @transform_7(%arg0: i32) -> (i32, i32) {
    %c0_i32 = arith.constant 0 : i32
    %c0_i32_0 = arith.constant 0 : i32
    %c0_i32_1 = arith.constant 0 : i32
    return %c0_i32, %c0_i32_0 : i32, i32
  }
  func.func @transform_8(%arg0: i32) -> (i32, i32) {
    %c0_i32 = arith.constant 0 : i32
    %c0_i32_0 = arith.constant 0 : i32
    %c0_i32_1 = arith.constant 0 : i32
    return %c0_i32, %c0_i32_0 : i32, i32
  }
  func.func @transform_9(%arg0: i32) -> (i32, i32) {
    %c0_i32 = arith.constant 0 : i32
    %c0_i32_0 = arith.constant 0 : i32
    return %arg0, %c0_i32 : i32, i32
  }
}

</mosaic_0001>

<bundles_post_ra>
// kernel: tpu_custom_call.1
= control target key start
LH: loop header
LB: loop body
LE: loop exit
PB: predicated region body
PF: predicated region fallthrough
CT: control target
= control target key end

     0   :  { %s2338_s0 = inlined_call_operand.hbm [shape: f32[24,128], index: 0, kind: input, shape index: {}]   ;;  %s2339_s1 = inlined_call_operand.hbm [shape: s32[24,1], index: 1, kind: input, shape index: {}]   ;;  %s2340_s2 = inlined_call_operand.hbm [shape: f32[128,128], index: 2, kind: input, shape index: {}]   ;;  %s2341_s3 = inlined_call_operand.hbm [shape: f32[128,128], index: 3, kind: input, shape index: {}]   ;;  %s2342_s4 = inlined_call_operand.hbm [shape: f32[1,128], index: 4, kind: input, shape index: {}]   ;;  %s2343_s5 = inlined_call_operand.hbm [shape: f32[128,128], index: 5, kind: input, shape index: {}]   ;;  %s2344_s6 = inlined_call_operand.hbm [shape: f32[1,128], index: 6, kind: input, shape index: {}]   ;;  %s2345_s7 = inlined_call_operand.hbm [shape: f32[128,128], index: 7, kind: input, shape index: {}]   ;;  %s2346_s8 = inlined_call_operand.hbm [shape: f32[1,128], index: 8, kind: input, shape index: {}]   ;;  %s2347_s9 = inlined_call_operand.hbm [shape: f32[24,128], index: 9, kind: output, shape index: {}]  }
   0x1   :  { %2353 = sst [smem:[#allocation25_spill]] %s2340_s2 }
   0x2   :  { %2354 = sst [smem:[#allocation26_spill]] %s2341_s3 }
   0x3   :  { %2355 = sst [smem:[#allocation27_spill]] %s2342_s4 }
   0x4   :  { %2356 = sst [smem:[#allocation28_spill]] %s2343_s5 }
   0x5   :  { %2357 = sst [smem:[#allocation29_spill]] %s2344_s6 }
   0x6   :  { %2358 = sst [smem:[#allocation30_spill]] %s2347_s9 }
   0x7   :  { %14 = vsyncpa [#allocation3], 0 }
   0x8   :  { %16 = vsyncpa [#allocation3 + $0x1], 0 }
   0x9   :  { %17 = vsyncpa [#allocation6], 0 }
   0xa   :  { %19 = vsyncpa [#allocation6 + $0x1], 0 }
   0xb   :  { %20 = vsyncpa [#allocation9], 0 }
   0xc   :  { %21 = vsyncpa [#allocation12], 0 }
   0xd   :  { %22 = vsyncpa [#allocation15], 0 }
   0xe   :  { %23 = vsyncpa [#allocation4], 0 }
   0xf   :  { %25 = vsyncpa [#allocation4 + $0x1], 0  ;;  %s1911_s30 = smov 0   ;;  %s1913_s10 = smov 0  }
  0x10   :  { %s1915_s11 = smov 0   ;;  %s1917_s12 = smov 0  }
  0x11 LB: > { %s1844_s13 = smov [#allocation7]   ;;  %s1932_s15 = sadd.s32 4294967295, %s1842_s12   ;;  %s1842_s12 = sphi %s1917_s12, %s2388_s12   ;;  %s1838_s11 = sphi %s1915_s11, %s2387_s11   ;;  %s1834_s10 = sphi %s1913_s10, %s2386_s10   ;;  %s1830_s30 = sphi %s1911_s30, %s2385_s30  }
  0x12   : > { %s273_s14 = sshll.u32 %s1844_s13, 4  ;;  %p1033_p0 = scmp.ge.s32.totalorder %s1842_s12, 1  ;;  %s1937_s14 = int_to_ptr.vmem [resolvable:$true] %s273_s14 }
  0x13   : > { %p2349_p1 = scmp.eq.s32.totalorder %s1932_s15, 0  ;;  %p261_p2 = scmp.lt.s32.totalorder %s1842_s12, 4 }
  0x14   : > { %s1845_s17 = smov [#allocation8]   ;;  %s1846_s20 = smov [#allocation11]  }
  0x15   : > { %p1939_p3 = pnand %p1033_p0, %p261_p2  ;;  %s286_s18 = sshll.u32 %s1845_s17, 4  ;;  %s1951_s18 = int_to_ptr.vmem [resolvable:$true] %s286_s18 }
  0x16   : > { %s310_s21 = sshll.u32 %s1846_s20, 4  ;;  %s2361_s2 = sld [smem:[#allocation25_spill]]  ;;  %s1953_s21 = int_to_ptr.vmem [resolvable:$true] %s310_s21 }
  0x17   : > { %s2359_s16 = scalar_select %p1939_p3, 1, 0 }
  0x18   : > { %p1404_p4 = pneg %p1939_p3 }
  0x1a   : > { %p1947_p5 = pnand %p1404_p4, %p2349_p1 }
  0x1c   : > { %s1500_s24 = scalar_lea.hbm %s2361_s2, 2048  ;;  %p1963_p7 = pneg %p1947_p5 }
  0x1d   : > { %p1501_p6 = scmp.ne.s32.totalorder %s2361_s2, %s1500_s24  ;;  %p1507_p10 = scmp.lt.u32.totalorder %s1500_s24, %s2361_s2 }
  0x1f   : > { %p1503_p8 = pnand %p1963_p7, %p1501_p6 }
  0x21   : > { %p1504_p9 = pneg %p1503_p8 }
  0x23   : > { %p1509_p11 = pnand %p1507_p10, %p1504_p9 }
  0x25   : > { %1512 = shalt.err (!%p1509_p11)
}
  0x26   : > { %s1513_s13 = scalar_lea.vmem %s1937_s14, 2048  ;;  %p1521_p2 = scmp.lt.s32.totalorder %s1937_s14, %s1937_s14 }
  0x27   : > { %p1514_p12 = scmp.ne.s32.totalorder %s1937_s14, %s1513_s13  ;;  %p1522_p4 = scmp.lt.s32.totalorder %s1513_s13, %s1513_s13 }
  0x29   : > { %p1516_p13 = pnand %p1514_p12, %p1963_p7  ;;  %p1523_p6 = por %p1522_p4, %p1521_p2 }
  0x2b   : > { %p1517_p0 = pneg %p1516_p13 }
  0x2d   : > { %p1524_p8 = pnand %p1523_p6, %p1517_p0 }
  0x2f   : > { %1527 = shalt.err (!%p1524_p8)
}
  0x30   : > { %s1847_s17 = smov 128   ;;  %s1848_s20 = smov 8  }
  0x31   : > { %1407 = dma.hbm_to_vmem [thread:$0]  (!%p1947_p5), %s2361_s2, 2048, %s1937_s14, [#allocation6], %s1847_s17, %s1847_s17, %s1848_s20  }
  0x32   : > { %s2363_s3 = sld [smem:[#allocation26_spill]] }
  0x38   : > { %s1528_s26 = scalar_lea.hbm %s2363_s3, 2048 }
  0x39   : > { %p1529_p9 = scmp.ne.s32.totalorder %s2363_s3, %s1528_s26  ;;  %p1535_p12 = scmp.lt.u32.totalorder %s1528_s26, %s2363_s3 }
  0x3b   : > { %p1531_p10 = pnand %p1529_p9, %p1963_p7 }
  0x3d   : > { %p1532_p11 = pneg %p1531_p10 }
  0x3f   : > { %p1537_p13 = pnand %p1535_p12, %p1532_p11 }
  0x41   : > { %1540 = shalt.err (!%p1537_p13)
}
  0x42   : > { %s1541_s14 = scalar_lea.vmem %s1951_s18, 2048  ;;  %p1549_p6 = scmp.lt.s32.totalorder %s1951_s18, %s1951_s18 }
  0x43   : > { %p1542_p0 = scmp.ne.s32.totalorder %s1951_s18, %s1541_s14  ;;  %p1550_p8 = scmp.lt.s32.totalorder %s1541_s14, %s1541_s14 }
  0x45   : > { %p1544_p2 = pnand %p1542_p0, %p1963_p7  ;;  %p1551_p9 = por %p1550_p8, %p1549_p6 }
  0x47   : > { %p1545_p4 = pneg %p1544_p2 }
  0x49   : > { %p1552_p10 = pnand %p1551_p9, %p1545_p4 }
  0x4b   : > { %1555 = shalt.err (!%p1552_p10)
}
  0x4c   : > { %1410 = dma.hbm_to_vmem [thread:$0]  (!%p1947_p5), %s2363_s3, 2048, %s1951_s18, [#allocation9], %s1847_s17, %s1847_s17, %s1848_s20  }
  0x4d   : > { %s2364_s5 = sld [smem:[#allocation28_spill]] }
  0x53   : > { %s1556_s25 = scalar_lea.hbm %s2364_s5, 2048 }
  0x54   : > { %p1557_p11 = scmp.ne.s32.totalorder %s2364_s5, %s1556_s25  ;;  %p1563_p0 = scmp.lt.u32.totalorder %s1556_s25, %s2364_s5 }
  0x56   : > { %p1559_p12 = pnand %p1557_p11, %p1963_p7 }
  0x58   : > { %p1560_p13 = pneg %p1559_p12 }
  0x5a   : > { %p1565_p2 = pnand %p1563_p0, %p1560_p13 }
  0x5c   : > { %1568 = shalt.err (!%p1565_p2)
}
  0x5d   : > { %s1569_s18 = scalar_lea.vmem %s1953_s21, 2048  ;;  %p1577_p9 = scmp.lt.s32.totalorder %s1953_s21, %s1953_s21 }
  0x5e   : > { %p1570_p4 = scmp.ne.s32.totalorder %s1953_s21, %s1569_s18  ;;  %p1578_p10 = scmp.lt.s32.totalorder %s1569_s18, %s1569_s18 }
  0x60   : > { %p1572_p6 = pnand %p1570_p4, %p1963_p7  ;;  %p1579_p11 = por %p1578_p10, %p1577_p9 }
  0x62   : > { %p1573_p8 = pneg %p1572_p6 }
  0x64   : > { %p1580_p12 = pnand %p1579_p11, %p1573_p8 }
  0x66   : > { %1583 = shalt.err (!%p1580_p12)
}
  0x67   : > { %1416 = dma.hbm_to_vmem [thread:$0]  (!%p1947_p5), %s2364_s5, 2048, %s1953_s21, [#allocation12], %s1847_s17, %s1847_s17, %s1848_s20  }
  0x68   : > { %s1849_s22 = smov [#allocation14]   ;;  %s1850_s24 = smov [#allocation10]  }
  0x69   : > { %s334_s23 = sshll.u32 %s1849_s22, 4  ;;  %s300_s25 = sshll.u32 %s1850_s24, 4  ;;  %s335_s23 = int_to_ptr.vmem [resolvable:$true] %s334_s23  ;;  %s301_s25 = int_to_ptr.vmem [resolvable:$true] %s300_s25 }
  0x6a   : > { %s1584_s29 = scalar_lea.hbm %s2345_s7, 2048 }
  0x6b   : > { %p1585_p13 = scmp.ne.s32.totalorder %s2345_s7, %s1584_s29  ;;  %p1591_p4 = scmp.lt.u32.totalorder %s1584_s29, %s2345_s7 }
  0x6d   : > { %p1587_p0 = pnand %p1585_p13, %p1963_p7 }
  0x6f   : > { %p1588_p2 = pneg %p1587_p0 }
  0x71   : > { %p1593_p6 = pnand %p1591_p4, %p1588_p2 }
  0x73   : > { %1596 = shalt.err (!%p1593_p6)
}
  0x74   : > { %s1597_s21 = scalar_lea.vmem %s335_s23, 2048  ;;  %p1605_p11 = scmp.lt.s32.totalorder %s335_s23, %s335_s23 }
  0x75   : > { %p1598_p8 = scmp.ne.s32.totalorder %s335_s23, %s1597_s21  ;;  %p1606_p12 = scmp.lt.s32.totalorder %s1597_s21, %s1597_s21 }
  0x77   : > { %p1600_p9 = pnand %p1598_p8, %p1963_p7  ;;  %p1607_p1 = por %p1606_p12, %p1605_p11 }
  0x79   : > { %p1601_p10 = pneg %p1600_p9 }
  0x7b   : > { %p1608_p3 = pnand %p1607_p1, %p1601_p10 }
  0x7d   : > { %1611 = shalt.err (!%p1608_p3)
}
  0x7e   : > { %1422 = dma.hbm_to_vmem [thread:$0]  (!%p1947_p5), %s2345_s7, 2048, %s335_s23, [#allocation15], %s1847_s17, %s1847_s17, %s1848_s20  }
  0x7f   : > { %s2365_s4 = sld [smem:[#allocation27_spill]] }
  0x85   : > { %s1612_s26 = scalar_lea.hbm %s2365_s4, 16 }
  0x86   : > { %p1613_p1 = scmp.ne.s32.totalorder %s2365_s4, %s1612_s26  ;;  %p1619_p0 = scmp.lt.u32.totalorder %s1612_s26, %s2365_s4 }
  0x88   : > { %p1615_p3 = pnand %p1613_p1, %p1963_p7 }
  0x8a   : > { %p1616_p13 = pneg %p1615_p3 }
  0x8c   : > { %p1621_p2 = pnand %p1619_p0, %p1616_p13 }
  0x8e   : > { %1624 = shalt.err (!%p1621_p2)
}
  0x8f   : > { %s1625_s14 = scalar_lea.vmem %s301_s25, 16  ;;  %s1632_s17 = scalar_lea.vmem %s301_s25, 32 }
  0x90   : > { %p1626_p4 = scmp.ne.s32.totalorder %s301_s25, %s1625_s14  ;;  %p1633_p9 = scmp.lt.s32.totalorder %s301_s25, %s301_s25 }
  0x91   : > { %p1634_p10 = scmp.lt.s32.totalorder %s1632_s17, %s1625_s14 }
  0x92   : > { %p1628_p6 = pnand %p1626_p4, %p1963_p7 }
  0x93   : > { %p1635_p11 = por %p1634_p10, %p1633_p9 }
  0x94   : > { %p1629_p8 = pneg %p1628_p6 }
  0x96   : > { %p1636_p12 = pnand %p1635_p11, %p1629_p8 }
  0x98   : > { %1639 = shalt.err (!%p1636_p12)
}
  0x99   : > { %1413 = dma.hbm_to_vmem [thread:$0]  (!%p1947_p5), %s2365_s4, 16, %s301_s25, [#allocation9]  }
  0x9a   : > { %s1851_s21 = smov [#allocation13]   ;;  %s1852_s9 = smov [#allocation16]  }
  0x9b   : > { %s324_s2 = sshll.u32 %s1851_s21, 4  ;;  %s348_s22 = sshll.u32 %s1852_s9, 4  ;;  %s325_s2 = int_to_ptr.vmem [resolvable:$true] %s324_s2  ;;  %s349_s22 = int_to_ptr.vmem [resolvable:$true] %s348_s22 }
  0x9c   : > { %s2366_s6 = sld [smem:[#allocation29_spill]] }
  0xa2   : > { %s1640_s28 = scalar_lea.hbm %s2366_s6, 16 }
  0xa3   : > { %p1641_p1 = scmp.ne.s32.totalorder %s2366_s6, %s1640_s28  ;;  %p1647_p0 = scmp.lt.u32.totalorder %s1640_s28, %s2366_s6 }
  0xa5   : > { %p1643_p3 = pnand %p1641_p1, %p1963_p7 }
  0xa7   : > { %p1644_p13 = pneg %p1643_p3 }
  0xa9   : > { %p1649_p2 = pnand %p1647_p0, %p1644_p13 }
  0xab   : > { %1652 = shalt.err (!%p1649_p2)
}
  0xac   : > { %s1653_s25 = scalar_lea.vmem %s325_s2, 16  ;;  %s1660_s17 = scalar_lea.vmem %s325_s2, 32 }
  0xad   : > { %p1654_p4 = scmp.ne.s32.totalorder %s325_s2, %s1653_s25  ;;  %p1661_p9 = scmp.lt.s32.totalorder %s325_s2, %s325_s2 }
  0xae   : > { %p1662_p10 = scmp.lt.s32.totalorder %s1660_s17, %s1653_s25 }
  0xaf   : > { %p1656_p6 = pnand %p1654_p4, %p1963_p7 }
  0xb0   : > { %p1663_p11 = por %p1662_p10, %p1661_p9 }
  0xb1   : > { %p1657_p8 = pneg %p1656_p6 }
  0xb3   : > { %p1664_p12 = pnand %p1663_p11, %p1657_p8 }
  0xb5   : > { %1667 = shalt.err (!%p1664_p12)
}
  0xb6   : > { %1419 = dma.hbm_to_vmem [thread:$0]  (!%p1947_p5), %s2366_s6, 16, %s325_s2, [#allocation12]  }
  0xb7   : > { %s1668_s24 = scalar_lea.hbm %s2346_s8, 16 }
  0xb8   : > { %p1669_p1 = scmp.ne.s32.totalorder %s2346_s8, %s1668_s24  ;;  %p1675_p0 = scmp.lt.u32.totalorder %s1668_s24, %s2346_s8 }
  0xba   : > { %p1671_p3 = pnand %p1669_p1, %p1963_p7 }
  0xbc   : > { %p1672_p13 = pneg %p1671_p3 }
  0xbe   : > { %p1677_p2 = pnand %p1675_p0, %p1672_p13 }
  0xc0   : > { %1680 = shalt.err (!%p1677_p2)
}
  0xc1   : > { %s1681_s18 = scalar_lea.vmem %s349_s22, 16  ;;  %s1688_s2 = scalar_lea.vmem %s349_s22, 32 }
  0xc2   : > { %p1682_p4 = scmp.ne.s32.totalorder %s349_s22, %s1681_s18  ;;  %p1689_p9 = scmp.lt.s32.totalorder %s349_s22, %s349_s22 }
  0xc3   : > { %p1690_p10 = scmp.lt.s32.totalorder %s1688_s2, %s1681_s18 }
  0xc4   : > { %p1684_p6 = pnand %p1682_p4, %p1963_p7 }
  0xc5   : > { %p1691_p11 = por %p1690_p10, %p1689_p9 }
  0xc6   : > { %p1685_p8 = pneg %p1684_p6 }
  0xc8   : > { %p1692_p12 = pnand %p1691_p11, %p1685_p8 }
  0xca   : > { %1695 = shalt.err (!%p1692_p12)
}
  0xcb   : > { %1425 = dma.hbm_to_vmem [thread:$0]  (!%p1947_p5), %s2346_s8, 16, %s349_s22, [#allocation15]  }
  0xcc   : > { %s1032_s27 = sadd.s32 4294967294, %s1842_s12   ;;  %s2116_s19 = sadd.s32 1, %s1842_s12  }
  0xcd   : > { %s38_s17 = sadd.s32 1, %s1838_s11  ;;  %s35_s20 = ssub.s32 %s1842_s12, %s2116_s19 }
  0xce   : > { %p45_p7 = scmp.ne.s32.totalorder %s1838_s11, %s1834_s10  ;;  %p36_p1 = scmp.eq.s32.totalorder %s35_s20, 0 }
  0xcf   : > { %p46_p3 = scmp.eq.s32.totalorder %s1842_s12, 0  ;;  %p51_p13 = scmp.ne.s32.totalorder %s1834_s10, %s1830_s30 }
  0xd0   : > { %p248_p0 = scmp.eq.s32.totalorder %s1932_s15, 2  ;;  %p2367_p4 = scmp.eq.s32.totalorder %s1932_s15, 0 }
  0xd1   : > { %s2128_s23 = scalar_select %p36_p1, %s1838_s11, %s38_s17  }
  0xd2   : > { %p47_p2 = por %p46_p3, %p45_p7  ;;  %p2132_p6 = por %p2367_p4, %p51_p13 }
  0xd3   : > { %p2136_p5 = por %p248_p0, %p45_p7  ;;  %p254_p8 = scmp.eq.s32.totalorder %s1032_s27, 2 }
  0xd4   : > { %s2368_s21 = scalar_select %p2132_p6, 1, 0 }
  0xd5   : > { %s2369_s22 = scalar_select %p2136_p5, 1, 0 }
  0xd6   : > { %p1444_p9 = scmp.lt.s32.totalorder %s1842_s12, 3  ;;  %s359_s9 = sand.u32 1, %s1838_s11  }
  0xd7   : > { %p2142_p10 = por %p254_p8, %p51_p13  ;;  %s2146_s26 = sshll.u32 %s359_s9, 3 }
  0xd8   : > { %s1043_s28 = sshll.u32 %s1842_s12, 7  ;;  %s363_s2 = scalar_lea.vmem [#allocation2], %s2146_s26 }
  0xd9   : > { %s2370_s24 = scalar_select %p2142_p10, 1, 0 }
  0xda   : > { %s2152_s18 = scalar_lea.hbm %s2338_s0, %s1043_s28  ;;  %s370_s14 = sshll.u32 %s363_s2, 4  ;;  %s2159_s14 = int_to_ptr.vmem [resolvable:$true] %s370_s14 }
  0xdb   : > { %p2155_p11 = pnand %p1444_p9, %p47_p2  ;;  %s2164_s20 = scalar_lea.hbm %s2339_s1, %s1043_s28 }
  0xdc   : > { %s360_s29 = scalar_lea.sflag [#allocation3], %s359_s9  ;;  %s1696_s13 = scalar_lea.hbm %s2152_s18, 128 }
  0xdd   : > { %p1697_p12 = scmp.ne.s32.totalorder %s2152_s18, %s1696_s13  ;;  %p1698_p7 = pneg %p2155_p11 }
  0xde   : > { %s1701_s4 = scalar_lea.hbm %s2338_s0, 384  ;;  %p1702_p13 = scmp.lt.u32.totalorder %s2152_s18, %s2338_s0 }
  0xdf   : > { %p1699_p1 = pnand %p1698_p7, %p1697_p12  ;;  %p1703_p0 = scmp.lt.u32.totalorder %s1701_s4, %s1696_s13 }
  0xe0   : > { %p1705_p4 = scmp.lt.u32.totalorder %s1696_s13, %s2152_s18 }
  0xe1   : > { %p1700_p3 = pneg %p1699_p1  ;;  %p1704_p2 = por %p1703_p0, %p1702_p13 }
  0xe3   : > { %p1706_p8 = por %p1705_p4, %p1704_p2 }
  0xe5   : > { %p1707_p9 = pnand %p1706_p8, %p1700_p3 }
  0xe7   : > { %1710 = shalt.err (!%p1707_p9)
}
  0xe8   : > { %s1711_s9 = scalar_lea.vmem %s2159_s14, 128  ;;  %s1853_s3 = smov [#allocation2]  }
  0xe9   : > { %p1712_p12 = scmp.ne.s32.totalorder %s2159_s14, %s1711_s9  ;;  %s1716_s28 = sshll.u32 %s1853_s3, 4  ;;  %s1717_s28 = int_to_ptr.vmem [resolvable:$false] %s1716_s28 }
  0xea   : > { %s1718_s5 = scalar_lea.vmem %s1717_s28, 256  ;;  %p1719_p5 = scmp.lt.s32.totalorder %s2159_s14, %s1717_s28 }
  0xeb   : > { %p1714_p1 = pnand %p1712_p12, %p1698_p7  ;;  %p1720_p13 = scmp.lt.s32.totalorder %s1718_s5, %s1711_s9 }
  0xed   : > { %p1715_p10 = pneg %p1714_p1  ;;  %p1721_p0 = por %p1720_p13, %p1719_p5 }
  0xef   : > { %p1722_p2 = pnand %p1721_p0, %p1715_p10 }
  0xf1   : > { %1725 = shalt.err (!%p1722_p2)
}
  0xf2   : > { %1429 = dma.hbm_to_vmem [thread:$0]  (!%p2155_p11), %s2152_s18, 128, %s2159_s14, %s360_s29  }
  0xf3   : > { %s377_s4 = sand.u32 1, %s1842_s12   ;;  %s381_s6 = scalar_lea.vmem [#allocation5], %s2146_s26 }
  0xf4   : > { %s388_s27 = sshll.u32 %s381_s6, 4  ;;  %s378_s17 = scalar_lea.sflag [#allocation6], %s377_s4  ;;  %s389_s27 = int_to_ptr.vmem [resolvable:$true] %s388_s27 }
  0xf5   : > { %s1726_s13 = scalar_lea.hbm %s2164_s20, 128  ;;  %s1731_s3 = scalar_lea.hbm %s2339_s1, 384 }
  0xf6   : > { %p1727_p5 = scmp.ne.s32.totalorder %s2164_s20, %s1726_s13  ;;  %p1732_p4 = scmp.lt.u32.totalorder %s2164_s20, %s2339_s1 }
  0xf7   : > { %p1733_p8 = scmp.lt.u32.totalorder %s1731_s3, %s1726_s13  ;;  %p1735_p12 = scmp.lt.u32.totalorder %s1726_s13, %s2164_s20 }
  0xf8   : > { %p1729_p10 = pnand %p1727_p5, %p1698_p7 }
  0xf9   : > { %p1734_p9 = por %p1733_p8, %p1732_p4 }
  0xfa   : > { %p1730_p3 = pneg %p1729_p10 }
  0xfb   : > { %p1736_p1 = por %p1735_p12, %p1734_p9 }
  0xfd   : > { %p1737_p13 = pnand %p1736_p1, %p1730_p3 }
  0xff   : > { %1740 = shalt.err (!%p1737_p13)
}
 0x100   : > { %s1741_s26 = scalar_lea.vmem %s389_s27, 128  ;;  %s1854_s18 = smov [#allocation5]  }
 0x101   : > { %p1742_p0 = scmp.ne.s32.totalorder %s389_s27, %s1741_s26  ;;  %s1746_s14 = sshll.u32 %s1854_s18, 4  ;;  %s1747_s14 = int_to_ptr.vmem [resolvable:$false] %s1746_s14 }
 0x102   : > { %s1748_s29 = scalar_lea.vmem %s1747_s14, 256  ;;  %p1749_p10 = scmp.lt.s32.totalorder %s389_s27, %s1747_s14 }
 0x103   : > { %p1744_p2 = pnand %p1742_p0, %p1698_p7  ;;  %p1750_p6 = scmp.lt.s32.totalorder %s1748_s29, %s1741_s26 }
 0x105   : > { %p1745_p5 = pneg %p1744_p2  ;;  %p1751_p4 = por %p1750_p6, %p1749_p10 }
 0x107   : > { %p1752_p8 = pnand %p1751_p4, %p1745_p5 }
 0x109   : > { %1755 = shalt.err (!%p1752_p8)
}
 0x10a   : > { %1432 = dma.hbm_to_vmem [thread:$0]  (!%p2155_p11), %s2164_s20, 128, %s389_s27, %s378_s17  }
 0x10b   : > { %p2372_p3 = scmp.ne.s32.totalorder %s2359_s16, 0 }
 0x10c   : > { %s2215_s4 = sand.u32 (!%p2372_p3), 1, %s1834_s10   ;;  %p2373_p6 = scmp.ne.s32.totalorder (!%p2372_p3), %s2368_s21, 0 }
 0x10d   : > { %397 = sbr.rel (%p2372_p3) target bundleno = 1087 (0x43f), region = 56  ;;  %s2218_s6 = sshll.u32 (!%p2372_p3), %s2215_s4, 3 }
 0x10e   : > { %s400_s13 = scalar_lea.sflag (!%p2372_p3), [#allocation3], %s2215_s4  ;;  %s403_s2 = scalar_lea.vmem (!%p2372_p3), [#allocation2], %s2218_s6 }
 0x114   : > { %1801 = dma.done.wait (%p2373_p6), %s400_s13, 128  }
 0x115   : > { %1803 = vsyncadd (%p2373_p6), %s400_s13, 4294967168  ;;  %s408_s16 = sand.u32 1, %s1932_s15   ;;  %s412_s20 = scalar_lea.vmem [#allocation5], %s2218_s6 }
 0x116   : > { %s409_s25 = scalar_lea.sflag [#allocation6], %s408_s16 }
 0x117   : > { %1805 = dma.done.wait (%p2373_p6), %s409_s25, 128  }
 0x118   : > { %1807 = vsyncadd (%p2373_p6), %s409_s25, 4294967168  ;;  %p2374_p11 = scmp.eq.s32.totalorder %s1932_s15, 0 }
 0x11a   : > { %1809 = dma.done.wait (%p2374_p11), [#allocation6], 2048   ;;  %p2375_p7 = pmov %p2374_p11 }
 0x11c   : > { %1811 = vsyncadd (%p2375_p7), [#allocation6], 4294965248  ;;  %p2376_p9 = pmov %p2375_p7 }
 0x11d   : > { %p2377_p12 = pmov %p2375_p7 }
 0x11e   : > { %1813 = dma.done.wait (%p2376_p9), [#allocation9], 2064  }
 0x11f   : > { %1815 = vsyncadd (%p2377_p12), [#allocation9], 4294965232  ;;  %p2378_p1 = pmov %p2375_p7 }
 0x121   : > { %1817 = dma.done.wait (%p2378_p1), [#allocation12], 2064   ;;  %p2379_p13 = pmov %p2378_p1 }
 0x122   : > { %p2380_p0 = pmov %p2378_p1 }
 0x123   : > { %1819 = vsyncadd (%p2379_p13), [#allocation12], 4294965232 }
 0x124   : > { %1821 = dma.done.wait (%p2380_p0), [#allocation15], 2064   ;;  %p2381_p2 = pmov %p2380_p0 }
 0x125   : > { %v1855_v0 = vmov 0   ;;  %v1856_v1 = vmov 0.0|0.0   ;;  %vm1857_vm0 = vmmov 0   ;;  %v1858_v2 = vmov 0.0   ;;  %v481_v3 = vld [vmem:[%s412_s20] sm:$0xff]  ;;  %v490_v4 = vld [vmem:[#allocation7] sm:$0xff] }
 0x126   : > { %1823 = vsyncadd (%p2381_p2), [#allocation15], 4294965232  ;;  %1499 = vset.pattern.permute.xlu0 %v1855_v0  ;;  %1298 = vmatprep.subr.bf16.mxu1 %v1856_v1  ;;  %v491_v5 = vld [vmem:[#allocation7 + $0x8] sm:$0xff]  ;;  %v506_v7 = vld [vmem:[#allocation8] sm:$0xff]  ;;  %v482_v53 = vlaneseq  ;;  %v1859_v61 = vmov 1.0   ;;  %s1063_s21 = sshll.u32 %s1932_s15, 7 }
 0x127   : > { %1274 = vmatprep.subr.bf16.mxu0 %v1856_v1  ;;  %1201 = vmatprep.mubr.msk.f32.mxu1 %vm1857_vm0, %v1858_v2  ;;  %v1299_v6 = vpack.c.bf16 %v491_v5, %v490_v4  ;;  %v507_v8 = vld [vmem:[#allocation8 + $0x8] sm:$0xff]  ;;  %v492_v9 = vld [vmem:[#allocation7 + $0x10] sm:$0xff]  ;;  %v493_v11 = vld [vmem:[#allocation7 + $0x18] sm:$0xff]  ;;  %s479_s27 = scalar_lea.vmem [#allocation17], %s2218_s6  ;;  %s2382_s28 = sld [smem:[#allocation30_spill]] }
 0x128   : > { %1166 = vmatprep.mubr.msk.f32.mxu0 %vm1857_vm0, %v1858_v2  ;;  %485 = vperm.xlu0 %1499, %v481_v3   ;;  %v1275_v10 = vpack.c.bf16 %v507_v8, %v506_v7  ;;  %v508_v12 = vld [vmem:[#allocation8 + $0x10] sm:$0xff]  ;;  %v509_v13 = vld [vmem:[#allocation8 + $0x18] sm:$0xff]  ;;  %v1302_v14 = vpack.c.bf16 %v493_v11, %v492_v9  ;;  %v494_v16 = vld [vmem:[#allocation7 + $0x20] sm:$0xff]  ;;  %v483_v56 = vand.u32 127, %v482_v53  ;;  %s873_s17 = sshll.u32 %s479_s27, 4  ;;  %s860_s26 = scalar_lea.sflag [#allocation4], %s2215_s4  ;;  %s2297_s17 = int_to_ptr.vmem [resolvable:$true] %s873_s17 }
 0x129   : > { %1300 = vmatpush3.bf16.msra.mxu1 %v1299_v6  ;;  %v1278_v15 = vpack.c.bf16 %v509_v13, %v508_v12  ;;  %v495_v17 = vld [vmem:[#allocation7 + $0x28] sm:$0xff]  ;;  %v510_v18 = vld [vmem:[#allocation8 + $0x20] sm:$0xff]  ;;  %v496_v22 = vld [vmem:[#allocation7 + $0x30] sm:$0xff]  ;;  %s1756_s18 = scalar_lea.vmem %s2297_s17, 128  ;;  %p2383_p10 = scmp.ne.s32.totalorder %s2369_s22, 0 }
 0x12a   : > { %1276 = vmatpush3.bf16.msra.mxu0 %v1275_v10  ;;  %1301 = vmatprep.subr.bf16.mxu1 %v1856_v1  ;;  %v511_v19 = vld [vmem:[#allocation8 + $0x28] sm:$0xff]  ;;  %v1305_v20 = vpack.c.bf16 %v495_v17, %v494_v16  ;;  %v497_v23 = vld [vmem:[#allocation7 + $0x38] sm:$0xff]  ;;  %v512_v24 = vld [vmem:[#allocation8 + $0x30] sm:$0xff]  ;;  %p1757_p5 = scmp.ne.s32.totalorder %s2297_s17, %s1756_s18  ;;  %s1860_s15 = smov [#allocation17]  }
 0x12b   : > { %1277 = vmatprep.subr.bf16.mxu0 %v1856_v1  ;;  %v1281_v21 = vpack.c.bf16 %v511_v19, %v510_v18  ;;  %v513_v25 = vld [vmem:[#allocation8 + $0x38] sm:$0xff]  ;;  %v1308_v26 = vpack.c.bf16 %v497_v23, %v496_v22  ;;  %v498_v28 = vld [vmem:[#allocation7 + $0x40] sm:$0xff]  ;;  %v499_v29 = vld [vmem:[#allocation7 + $0x48] sm:$0xff]  ;;  %s1760_s14 = sshll.u32 %s1860_s15, 4  ;;  %s1761_s14 = int_to_ptr.vmem [resolvable:$false] %s1760_s14 }
 0x12c   : > { %v1284_v27 = vpack.c.bf16 %v513_v25, %v512_v24  ;;  %v514_v30 = vld [vmem:[#allocation8 + $0x40] sm:$0xff]  ;;  %v515_v31 = vld [vmem:[#allocation8 + $0x48] sm:$0xff]  ;;  %v1311_v32 = vpack.c.bf16 %v499_v29, %v498_v28  ;;  %v500_v34 = vld [vmem:[#allocation7 + $0x50] sm:$0xff]  ;;  %p1758_p4 = pnand %p1757_p5, %p2383_p10  ;;  %s1762_s29 = scalar_lea.vmem %s1761_s14, 256 }
 0x12d   : > { %1303 = vmatpush3.bf16.msra.mxu1 %v1302_v14  ;;  %v1287_v33 = vpack.c.bf16 %v515_v31, %v514_v30  ;;  %v501_v35 = vld [vmem:[#allocation7 + $0x58] sm:$0xff]  ;;  %v516_v36 = vld [vmem:[#allocation8 + $0x50] sm:$0xff]  ;;  %v502_v40 = vld [vmem:[#allocation7 + $0x60] sm:$0xff]  ;;  %s2295_s5 = scalar_lea.hbm %s2382_s28, %s1063_s21  ;;  %p1763_p3 = scmp.lt.s32.totalorder %s2297_s17, %s1761_s14 }
 0x12e   : > { %1279 = vmatpush3.bf16.msra.mxu0 %v1278_v15  ;;  %1304 = vmatprep.subr.bf16.mxu1 %v1856_v1  ;;  %v517_v37 = vld [vmem:[#allocation8 + $0x58] sm:$0xff]  ;;  %v1314_v38 = vpack.c.bf16 %v501_v35, %v500_v34  ;;  %v503_v41 = vld [vmem:[#allocation7 + $0x68] sm:$0xff]  ;;  %v518_v42 = vld [vmem:[#allocation8 + $0x60] sm:$0xff]  ;;  %p1759_p8 = pneg %p1758_p4  ;;  %p1764_p6 = scmp.lt.s32.totalorder %s1762_s29, %s1756_s18 }
 0x12f   : > { %1280 = vmatprep.subr.bf16.mxu0 %v1856_v1  ;;  %v1290_v39 = vpack.c.bf16 %v517_v37, %v516_v36  ;;  %v519_v43 = vld [vmem:[#allocation8 + $0x68] sm:$0xff]  ;;  %v1317_v44 = vpack.c.bf16 %v503_v41, %v502_v40  ;;  %v504_v46 = vld [vmem:[#allocation7 + $0x70] sm:$0xff]  ;;  %v505_v47 = vld [vmem:[#allocation7 + $0x78] sm:$0xff] }
 0x130   : > { %v1293_v45 = vpack.c.bf16 %v519_v43, %v518_v42  ;;  %v520_v48 = vld [vmem:[#allocation8 + $0x70] sm:$0xff]  ;;  %v521_v49 = vld [vmem:[#allocation8 + $0x78] sm:$0xff]  ;;  %v1320_v50 = vpack.c.bf16 %v505_v47, %v504_v46  ;;  %v480_v52 = vld [vmem:[%s403_s2] sm:$0xff]  ;;  %p1765_p11 = por %p1764_p6, %p1763_p3 }
 0x131   : > { %1306 = vmatpush3.bf16.msra.mxu1 %v1305_v20  ;;  %v1296_v51 = vpack.c.bf16 %v521_v49, %v520_v48  ;;  %v671_v54 = vld [vmem:[#allocation11] sm:$0xff]  ;;  %v672_v55 = vld [vmem:[#allocation11 + $0x8] sm:$0xff]  ;;  %v673_v59 = vld [vmem:[#allocation11 + $0x10] sm:$0xff] }
 0x132   : > { %1282 = vmatpush3.bf16.msra.mxu0 %v1281_v21  ;;  %1307 = vmatprep.subr.bf16.mxu1 %v1856_v1  ;;  %v1323_v57 = vpack.c.bf16 %v672_v55, %v671_v54  ;;  %v674_v60 = vld [vmem:[#allocation11 + $0x18] sm:$0xff]  ;;  %v675_v63 = vld [vmem:[#allocation11 + $0x20] sm:$0xff]  ;;  %v676_v0 = vld [vmem:[#allocation11 + $0x28] sm:$0xff]  ;;  %p1766_p7 = pnand %p1765_p11, %p1759_p8 }
 0x133   : > { %1283 = vmatprep.subr.bf16.mxu0 %v1856_v1  ;;  %v1326_v62 = vpack.c.bf16 %v674_v60, %v673_v59  ;;  %v1329_v3 = vpack.c.bf16 %v676_v0, %v675_v63  ;;  %v677_v4 = vld [vmem:[#allocation11 + $0x30] sm:$0xff]  ;;  %v678_v5 = vld [vmem:[#allocation11 + $0x38] sm:$0xff]  ;;  %v679_v7 = vld [vmem:[#allocation11 + $0x40] sm:$0xff] }
 0x134   : > { %v1332_v6 = vpack.c.bf16 %v678_v5, %v677_v4  ;;  %v680_v8 = vld [vmem:[#allocation11 + $0x48] sm:$0xff]  ;;  %v682_v10 = vld [vmem:[#allocation11 + $0x58] sm:$0xff]  ;;  %v683_v12 = vld [vmem:[#allocation11 + $0x60] sm:$0xff] }
 0x135   : > { %1309 = vmatpush3.bf16.msra.mxu1 %v1308_v26  ;;  %v1335_v9 = vpack.c.bf16 %v680_v8, %v679_v7  ;;  %v684_v13 = vld [vmem:[#allocation11 + $0x68] sm:$0xff]  ;;  %v685_v15 = vld [vmem:[#allocation11 + $0x70] sm:$0xff]  ;;  %v686_v16 = vld [vmem:[#allocation11 + $0x78] sm:$0xff] }
 0x136   : > { %1285 = vmatpush3.bf16.msra.mxu0 %v1284_v27  ;;  %1310 = vmatprep.subr.bf16.mxu1 %v1856_v1  ;;  %v1341_v14 = vpack.c.bf16 %v684_v13, %v683_v12  ;;  %v1344_v17 = vpack.c.bf16 %v686_v16, %v685_v15  ;;  %v765_v18 = vld [vmem:[#allocation14] sm:$0xff]  ;;  %v766_v19 = vld [vmem:[#allocation14 + $0x8] sm:$0xff]  ;;  %v767_v20 = vld [vmem:[#allocation14 + $0x10] sm:$0xff] }
 0x137   : > { %1286 = vmatprep.subr.bf16.mxu0 %v1856_v1  ;;  %v1347_v21 = vpack.c.bf16 %v766_v19, %v765_v18  ;;  %v768_v22 = vld [vmem:[#allocation14 + $0x18] sm:$0xff]  ;;  %v769_v24 = vld [vmem:[#allocation14 + $0x20] sm:$0xff]  ;;  %v770_v25 = vld [vmem:[#allocation14 + $0x28] sm:$0xff] }
 0x138   : > { %v1350_v23 = vpack.c.bf16 %v768_v22, %v767_v20  ;;  %v1353_v26 = vpack.c.bf16 %v770_v25, %v769_v24  ;;  %v771_v27 = vld [vmem:[#allocation14 + $0x30] sm:$0xff]  ;;  %v772_v28 = vld [vmem:[#allocation14 + $0x38] sm:$0xff]  ;;  %v773_v30 = vld [vmem:[#allocation14 + $0x40] sm:$0xff] }
 0x139   : > { %1312 = vmatpush3.bf16.msra.mxu1 %v1311_v32  ;;  %v1356_v29 = vpack.c.bf16 %v772_v28, %v771_v27  ;;  %v774_v31 = vld [vmem:[#allocation14 + $0x48] sm:$0xff]  ;;  %v776_v34 = vld [vmem:[#allocation14 + $0x58] sm:$0xff]  ;;  %v777_v36 = vld [vmem:[#allocation14 + $0x60] sm:$0xff] }
 0x13a   : > { %1288 = vmatpush3.bf16.msra.mxu0 %v1287_v33  ;;  %1313 = vmatprep.subr.bf16.mxu1 %v1856_v1  ;;  %v1359_v32 = vpack.c.bf16 %v774_v31, %v773_v30  ;;  %v775_v33 = vld [vmem:[#allocation14 + $0x50] sm:$0xff]  ;;  %v778_v37 = vld [vmem:[#allocation14 + $0x68] sm:$0xff]  ;;  %v1059_v42 = vld [vmem:[#allocation10] ss:$0 sm:$0xff] }
 0x13b   : > { %1289 = vmatprep.subr.bf16.mxu0 %v1856_v1  ;;  %v1362_v35 = vpack.c.bf16 %v776_v34, %v775_v33  ;;  %v779_v47 = vld [vmem:[#allocation14 + $0x70] sm:$0xff]  ;;  %v780_v48 = vld [vmem:[#allocation14 + $0x78] sm:$0xff]  ;;  %v1061_v54 = vld [vmem:[#allocation16] ss:$0 sm:$0xff] }
 0x13c   : > { %v1368_v49 = vpack.c.bf16 %v780_v48, %v779_v47 }
 0x13d   : > { %1315 = vmatpush3.bf16.msra.mxu1 %v1314_v38  ;;  %v1365_v38 = vpack.c.bf16 %v778_v37, %v777_v36 }
 0x13e   : > { %1291 = vmatpush3.bf16.msra.mxu0 %v1290_v39  ;;  %1316 = vmatprep.subr.bf16.mxu1 %v1856_v1 }
 0x13f   : > { %1292 = vmatprep.subr.bf16.mxu0 %v1856_v1 }
 0x141   : > { %1318 = vmatpush3.bf16.msra.mxu1 %v1317_v44 }
 0x142   : > { %1294 = vmatpush3.bf16.msra.mxu0 %v1293_v45  ;;  %1319 = vmatprep.subr.bf16.mxu1 %v1856_v1 }
 0x143   : > { %1295 = vmatprep.subr.bf16.mxu0 %v1856_v1 }
 0x145   : > { %1321 = vmatpush3.bf16.msra.mxu1 %v1320_v50  ;;  %v1060_v50 = vld [vmem:[#allocation13] ss:$0 sm:$0xff] }
 0x146   : > { %1297 = vmatpush3.bf16.msra.mxu0 %v1296_v51  ;;  %1346 = vmatprep.subr.bf16.mxu1 %v1856_v1 }
 0x147   : > { %1322 = vmatprep.subr.bf16.mxu0 %v1856_v1 }
 0x148   : > { %1202 = vmatmul.mubr.f32.vlgmr.msra.gmra.mrb[0].mxu1 %v480_v52 }
 0x149   : > { %1271 = vmatprep.mubr.msk.f32.mxu1 %vm1857_vm0, %v1858_v2  ;;  %1348 = vmatpush3.bf16.msra.mxu1 %v1347_v21 }
 0x14a   : > { %1349 = vmatprep.subr.bf16.mxu1 %v1856_v1 }
 0x14d   : > { %1351 = vmatpush3.bf16.msra.mxu1 %v1350_v23 }
 0x14e   : > { %1352 = vmatprep.subr.bf16.mxu1 %v1856_v1 }
 0x151   : > { %1354 = vmatpush3.bf16.msra.mxu1 %v1353_v26 }
 0x152   : > { %1355 = vmatprep.subr.bf16.mxu1 %v1856_v1 }
 0x155   : > { %1357 = vmatpush3.bf16.msra.mxu1 %v1356_v29 }
 0x156   : > { %1358 = vmatprep.subr.bf16.mxu1 %v1856_v1 }
 0x159   : > { %1360 = vmatpush3.bf16.msra.mxu1 %v1359_v32 }
 0x15a   : > { %1361 = vmatprep.subr.bf16.mxu1 %v1856_v1 }
 0x15d   : > { %1363 = vmatpush3.bf16.msra.mxu1 %v1362_v35 }
 0x15e   : > { %1364 = vmatprep.subr.bf16.mxu1 %v1856_v1 }
 0x161   : > { %1366 = vmatpush3.bf16.msra.mxu1 %v1365_v38 }
 0x162   : > { %1367 = vmatprep.subr.bf16.mxu1 %v1856_v1 }
 0x165   : > { %1369 = vmatpush3.bf16.msra.mxu1 %v1368_v49 }
 0x1a7   : > { %v486_v58 = vpop.permute.xlu0 %485 }
 0x1a8   : > { %vm487_vm1 = vcmp.eq.s32.totalorder %v483_v56, %v486_v58 }
 0x1a9   : > { %1167 = vmatmul.mubr.msk.f32.vlgmr.msra.gmra.mrb[0].mxu0 %vm487_vm1, %v1859_v61 }
 0x1aa   : > { %1324 = vmatpush3.bf16.msra.mxu0 %v1323_v57  ;;  %1236 = vmatprep.mubr.msk.f32.mxu0 %vm1857_vm0, %v1858_v2  ;;  %v681_v2 = vld [vmem:[#allocation11 + $0x50] sm:$0xff] }
 0x1ab   : > { %1325 = vmatprep.subr.bf16.mxu0 %v1856_v1  ;;  %v1338_v11 = vpack.c.bf16 %v682_v10, %v681_v2 }
 0x1ae   : > { %1327 = vmatpush3.bf16.msra.mxu0 %v1326_v62 }
 0x1af   : > { %1328 = vmatprep.subr.bf16.mxu0 %v1856_v1 }
 0x1b2   : > { %1330 = vmatpush3.bf16.msra.mxu0 %v1329_v3 }
 0x1b3   : > { %1331 = vmatprep.subr.bf16.mxu0 %v1856_v1 }
 0x1b6   : > { %1333 = vmatpush3.bf16.msra.mxu0 %v1332_v6 }
 0x1b7   : > { %1334 = vmatprep.subr.bf16.mxu0 %v1856_v1 }
 0x1ba   : > { %1336 = vmatpush3.bf16.msra.mxu0 %v1335_v9 }
 0x1bb   : > { %1337 = vmatprep.subr.bf16.mxu0 %v1856_v1 }
 0x1be   : > { %1339 = vmatpush3.bf16.msra.mxu0 %v1338_v11 }
 0x1bf   : > { %1340 = vmatprep.subr.bf16.mxu0 %v1856_v1 }
 0x1c2   : > { %1342 = vmatpush3.bf16.msra.mxu0 %v1341_v14 }
 0x1c3   : > { %1343 = vmatprep.subr.bf16.mxu0 %v1856_v1 }
 0x1c6   : > { %1345 = vmatpush3.bf16.msra.mxu0 %v1344_v17 }
 0x21b   : > { %v658_v39 = vpop.f32.mrb[0].mxu1 }
 0x21c   : > { %v1203_v40 = vpop.f32.mrb[1].mxu1 }
 0x27c   : > { %v588_v41 = vpop.f32.mrb[0].mxu0 }
 0x27d   : > { %v659_v43 = vadd.f32 %v658_v39, %v588_v41  ;;  %v1168_v44 = vpop.f32.mrb[1].mxu0 }
 0x27f   : > { %v669_v45 = vadd.f32 %v1059_v42, %v659_v43 }
 0x281   : > { %v670_v46 = vmax.f32 %v669_v45, 0.0 }
 0x283   : > { %1237 = vmatmul.mubr.f32.vlgmr.msra.gmra.mrb[2].mxu0 %v670_v46 }
 0x356   : > { %v760_v51 = vpop.f32.mrb[2].mxu0 }
 0x357   : > { %v761_v52 = vadd.f32 %v1060_v50, %v760_v51  ;;  %v1238_v53 = vpop.f32.mrb[3].mxu0 }
 0x359   : > { %v764_v1 = vmax.f32 %v761_v52, 0.0 }
 0x35b   : > { %1272 = vmatmul.mubr.f32.vlgmr.msra.gmra.mrb[2].mxu1 %v764_v1 }
 0x42e   : > { %v854_v55 = vpop.f32.mrb[2].mxu1 }
 0x42f   : > { %v855_v56 = vadd.f32 %v1061_v54, %v854_v55  ;;  %v1273_v57 = vpop.f32.mrb[3].mxu1 }
 0x431   : > { %858 = vst [vmem:[%s479_s27] sm:$0xff] %v855_v56 }
 0x432   : > { %1769 = shalt.err (!%p1766_p7)
}
 0x433   : > { %s1770_s4 = scalar_lea.hbm %s2295_s5, 128  ;;  %s1774_s2 = scalar_lea.hbm %s2382_s28, 384 }
 0x434   : > { %p1771_p9 = scmp.ne.s32.totalorder %s2295_s5, %s1770_s4  ;;  %p1775_p13 = scmp.lt.u32.totalorder %s2295_s5, %s2382_s28 }
 0x435   : > { %p1776_p0 = scmp.lt.u32.totalorder %s1774_s2, %s1770_s4  ;;  %p1778_p5 = scmp.lt.u32.totalorder %s1770_s4, %s2295_s5 }
 0x436   : > { %p1772_p12 = pnand %p1771_p9, %p2383_p10 }
 0x437   : > { %p1777_p2 = por %p1776_p0, %p1775_p13 }
 0x438   : > { %p1773_p1 = pneg %p1772_p12 }
 0x439   : > { %p1779_p4 = por %p1778_p5, %p1777_p2 }
 0x43b   : > { %p1780_p8 = pnand %p1779_p4, %p1773_p1 }
 0x43d   : > { %1783 = shalt.err (!%p1780_p8)
}
 0x43e   : > { %1402 = dma.vmem_to_hbm [thread:$0]  (%p2383_p10), %s2297_s17, 128, %s2295_s5, %s860_s26  }
 0x43f PF: > { %p1452_p3 = scmp.ge.s32.totalorder %s1842_s12, 2  ;;  %s885_s20 = sand.u32 1, %s1830_s30  }
 0x440   : > { %p2384_p6 = scmp.ne.s32.totalorder %s2370_s24, 0  ;;  %s886_s21 = scalar_lea.sflag [#allocation4], %s885_s20 }
 0x442   : > { %p1434_p11 = pnand %p1452_p3, %p2384_p6 }
 0x444   : > { %1825 = dma.done.wait (!%p1434_p11), %s886_s21, 128  }
 0x445   : > { %1827 = vsyncadd (!%p1434_p11), %s886_s21, 4294967168  ;;  %p28_p7 = scmp.ge.s32.totalorder %s2116_s19, 5   ;;  %s2385_s30 = smov %s1834_s10 }
 0x446   : > { %s2386_s10 = smov %s1838_s11  ;;  %s2387_s11 = smov %s2128_s23 }
 0x447   : > { %s2388_s12 = smov %s2116_s19  ;;  %30 = sbr.rel (!%p28_p7) target bundleno = 17 (0x11), region = 142 }
 0x44e   :  { %891 = vsyncpa [#allocation3], 1 }
 0x44f   :  { %893 = vsyncpa [#allocation3 + $0x1], 1 }
 0x450   :  { %894 = vsyncpa [#allocation6], 1 }
 0x451   :  { %896 = vsyncpa [#allocation6 + $0x1], 1 }
 0x452   :  { %897 = vsyncpa [#allocation9], 1 }
 0x453   :  { %898 = vsyncpa [#allocation12], 1 }
 0x454   :  { %899 = vsyncpa [#allocation15], 1 }
 0x455   :  { %900 = vsyncpa [#allocation4], 1 }
 0x456   :  { %902 = vsyncpa [#allocation4 + $0x1], 1 }

</bundles_post_ra>
